<compile_context>
chip_gen: v7x
topology: tpu7x:2x2x1
jax: 0.10.0
libtpu: 0.0.40
codegen_flags: <defaults>
</compile_context>

<pallas_src>
import functools

import jax
import jax.numpy as jnp
from jax import lax
from jax.experimental import pallas as pl
from jax.experimental.pallas import tpu as pltpu


def _round_up(x, m):
    return ((x + m - 1) // m) * m


def _neg_fill(dtype):
    if jnp.issubdtype(dtype, jnp.floating):
        return jnp.array(-jnp.inf, dtype)
    return jnp.array(jnp.iinfo(dtype).min, dtype)


def _default_tiles():
    """Generation-dependent block sizes (per-step bytes vs scoped-VMEM default)."""
    try:
        kind = jax.devices()[0].device_kind.lower()
    except Exception:
        kind = ""
    if ("v6" in kind) or ("v7" in kind) or ("7x" in kind):
        # 32 MiB scoped-VMEM default: 8 MiB f32 blocks double-buffer to 16 MiB.
        return 1024, 2048
    # v5e (16 MiB scoped default) and unknown chips: 4 MiB f32 blocks.
    return 512, 2048


def _max_pool_kernel_single(x_ref, o_ref):
    # grid_k == 1: whole reduction axis in one block -> no scratch, no pl.when.
    # x_ref: (TM, N), o_ref: (1, 1, TM)
    o_ref[...] = (
        jnp.max(x_ref[...], axis=-1).reshape(o_ref.shape).astype(o_ref.dtype)
    )


def _max_pool_kernel_multi(x_ref, o_ref, acc_ref, *, n_total, tn, ragged_n):
    # x_ref: (TM, TN) input tile; o_ref: (1, 1, TM) output (resident across k);
    # acc_ref: (1, TM) f32 running max.
    k = pl.program_id(1)
    last = pl.num_programs(1) - 1

    def _reduce_plain():
        # Reduce in native dtype (max is exact); cast only the (1, TM) partial.
        return (
            jnp.max(x_ref[...], axis=-1)
            .astype(jnp.float32)
            .reshape(acc_ref.shape)
        )

    if ragged_n:
        # -inf mask only on the last (partial) N block; every other step is a
        # plain max so the iota/select VALU work runs on 1/grid_k of the steps.
        @pl.when(k == last)
        def _():
            x = x_ref[...]
            col = lax.broadcasted_iota(jnp.int32, x.shape, 1) + k * tn
            x = jnp.where(col < n_total, x, _neg_fill(x.dtype))
            part = jnp.max(x, axis=-1).astype(jnp.float32).reshape(acc_ref.shape)
            # grid_k >= 2 on this path, so k == last implies acc is initialised.
            acc_ref[...] = jnp.maximum(acc_ref[...], part)

        @pl.when(k != last)
        def _():
            part = _reduce_plain()

            @pl.when(k == 0)
            def _():
                acc_ref[...] = part

            @pl.when(k != 0)
            def _():
                acc_ref[...] = jnp.maximum(acc_ref[...], part)

    else:
        part = _reduce_plain()

        @pl.when(k == 0)
        def _():
            acc_ref[...] = part

        @pl.when(k != 0)
        def _():
            acc_ref[...] = jnp.maximum(acc_ref[...], part)

    @pl.when(k == last)
    def _():
        o_ref[...] = acc_ref[...].reshape(o_ref.shape).astype(o_ref.dtype)


def max_pooling(sims, *, tm=None, tn=None):
    """Pallas implementation of MaxPooling.forward: max over the last axis.

    sims: (B, M, N) array. Returns (B, M).
    """
    assert sims.ndim == 3
    B, M, N = sims.shape
    R = B * M

    d_tm, d_tn = _default_tiles()
    tm = d_tm if tm is None else tm
    tn = d_tn if tn is None else tn

    x = sims.reshape(R, N)  # contiguous -> free reshape, no HBM copy

    # Row tile: sublane-aligned; if all rows fit in one block, split in two so
    # the "parallel" row axis can shard across v7x's 2 TensorCores.
    if 8 < R <= tm:
        TM = _round_up(pl.cdiv(R, 2), 8)
    else:
        TM = min(tm, _round_up(R, 8))
    TN = N if N <= tn else tn  # full N if it fits, else 128-aligned tile
    grid_r = pl.cdiv(R, TM)
    grid_k = pl.cdiv(N, TN)
    ragged_n = (N % TN) != 0

    itemsize = jnp.dtype(sims.dtype).itemsize
    cost = pl.CostEstimate(
        flops=R * N,
        transcendentals=0,
        bytes_accessed=R * N * itemsize + R * itemsize,
    )

    if grid_k == 1:
        # Fast path: the whole reduction axis fits in one block.
        out = pl.pallas_call(
            _max_pool_kernel_single,
            out_shape=jax.ShapeDtypeStruct((grid_r, 1, TM), sims.dtype),
            grid_spec=pltpu.PrefetchScalarGridSpec(
                num_scalar_prefetch=0,
                grid=(grid_r,),
                in_specs=[pl.BlockSpec((TM, N), lambda i: (i, 0))],
                out_specs=pl.BlockSpec((1, 1, TM), lambda i: (i, 0, 0)),
            ),
            compiler_params=pltpu.CompilerParams(
                dimension_semantics=("parallel",),
            ),
            cost_estimate=cost,
        )(x)
    else:
        kernel = functools.partial(
            _max_pool_kernel_multi, n_total=N, tn=TN, ragged_n=ragged_n
        )
        out = pl.pallas_call(
            kernel,
            out_shape=jax.ShapeDtypeStruct((grid_r, 1, TM), sims.dtype),
            grid_spec=pltpu.PrefetchScalarGridSpec(
                num_scalar_prefetch=0,
                grid=(grid_r, grid_k),
                in_specs=[pl.BlockSpec((TM, TN), lambda i, k: (i, k))],
                out_specs=pl.BlockSpec((1, 1, TM), lambda i, k: (i, 0, 0)),
                scratch_shapes=[pltpu.VMEM((1, TM), jnp.float32)],
            ),
            compiler_params=pltpu.CompilerParams(
                dimension_semantics=("parallel", "arbitrary"),
            ),
            cost_estimate=cost,
        )(x)

    # Drop padded tail rows (garbage from the partial last row block) and
    # restore (B, M). The raw (grid_r, 1, TM) slab must never be consumed.
    return out.reshape(grid_r * TM)[:R].reshape(B, M)


if __name__ == "__main__":
    key = jax.random.PRNGKey(0)
    k1, k2, k3, k4 = jax.random.split(key, 4)

    # 1) Small (batch, queries, keys) tensor: single-N-block fast path, and the
    #    row axis split in two (grid_r == 2) for megacore sharding.
    B, M, N = 2, 8, 16
    sims = jax.random.normal(k1, (B, M, N), dtype=jnp.float32)
    out = jax.block_until_ready(max_pooling(sims))
    ref = jnp.max(sims, axis=-1)
    assert out.shape == (B, M)
    assert jnp.allclose(out, ref, atol=1e-6, rtol=1e-6), "mismatch on (2, 8, 16)"

    # 2) Forced tiny tiles: multiple row blocks (partial last), multiple N
    #    blocks with a ragged last block, accumulator across the k axis.
    B2, M2, N2 = 2, 20, 300
    sims2 = jax.random.normal(k2, (B2, M2, N2), dtype=jnp.float32)
    out2 = jax.block_until_ready(max_pooling(sims2, tm=16, tn=128))
    ref2 = jnp.max(sims2, axis=-1)
    assert out2.shape == (B2, M2)
    assert jnp.allclose(out2, ref2, atol=1e-6, rtol=1e-6), "mismatch on (2, 20, 300)"

    # 3) Multi-k, non-ragged path (N divisible by TN).
    B3, M3, N3 = 1, 16, 256
    sims3 = jax.random.normal(k3, (B3, M3, N3), dtype=jnp.float32)
    out3 = jax.block_until_ready(max_pooling(sims3, tm=8, tn=128))
    ref3 = jnp.max(sims3, axis=-1)
    assert jnp.allclose(out3, ref3, atol=1e-6, rtol=1e-6), "mismatch on (1, 16, 256)"

    # 4) bf16 input: native-dtype reduce path (max is exact in bf16).
    B4, M4, N4 = 2, 12, 520
    sims4 = jax.random.normal(k4, (B4, M4, N4), dtype=jnp.float32).astype(jnp.bfloat16)
    out4 = jax.block_until_ready(max_pooling(sims4, tm=8, tn=256))
    ref4 = jnp.max(sims4, axis=-1)
    assert out4.dtype == jnp.bfloat16
    assert jnp.array_equal(out4, ref4), "mismatch on bf16 (2, 12, 520)"

    print("KERNEL_OK")
</pallas_src>

<mosaic_0001>
module attributes {stable_mosaic.version = 11 : i64} {
  func.func @_max_pool_kernel_single(%arg0: i32, %arg1: memref<8x16xf32, #tpu.memory_space<vmem>>, %arg2: memref<1x1x8xf32, #tpu.memory_space<vmem>>) attributes {dimension_semantics = [#tpu.dimension_semantics<parallel>], iteration_bounds = array<i64: 2>, scalar_prefetch = 0 : i64, scratch_operands = 0 : i64, tpu.core_type = #tpu.core_type<tc>, window_params = [{transform_indices = @transform_0, window_bounds = array<i64: 8, 16>}, {transform_indices = @transform_1, window_bounds = array<i64: 1, 1, 8>}]} {
    %c0 = arith.constant 0 : index
    %c0_0 = arith.constant 0 : index
    %0 = vector.load %arg1[%c0, %c0_0] : memref<8x16xf32, #tpu.memory_space<vmem>>, vector<8x16xf32>
    %cst = arith.constant dense<0xFF800000> : vector<8xf32>
    %1 = vector.multi_reduction <maximumf>, %0, %cst [1] : vector<8x16xf32> to vector<8xf32>
    %2 = vector.shape_cast %1 : vector<8xf32> to vector<1x1x8xf32>
    %c0_1 = arith.constant 0 : index
    %c0_2 = arith.constant 0 : index
    %c0_3 = arith.constant 0 : index
    %3 = vector.load %arg2[%c0_1, %c0_2, %c0_3] : memref<1x1x8xf32, #tpu.memory_space<vmem>>, vector<1x1x8xf32>
    tpu.vector_store %arg2[%c0_1, %c0_2, %c0_3], %2 {strides = array<i32>} : memref<1x1x8xf32, #tpu.memory_space<vmem>>, vector<1x1x8xf32>,
    return
  }
  func.func @transform_0(%arg0: i32) -> (i32, i32) {
    %c0_i32 = arith.constant 0 : i32
    %c0_i32_0 = arith.constant 0 : i32
    return %arg0, %c0_i32 : i32, i32
  }
  func.func @transform_1(%arg0: i32) -> (i32, i32, i32) {
    %c0_i32 = arith.constant 0 : i32
    %c0_i32_0 = arith.constant 0 : i32
    %c0_i32_1 = arith.constant 0 : i32
    return %arg0, %c0_i32, %c0_i32_0 : i32, i32, i32
  }
}

</mosaic_0001>

<bundles_post_ra>
// kernel: tpu_custom_call.1
= control target key start
LH: loop header
LB: loop body
LE: loop exit
PB: predicated region body
PF: predicated region fallthrough
CT: control target
= control target key end

     0   :  { %6 = vsyncpa [#allocation3], 0  ;;  %s553_s0 = inlined_call_operand.hbm [shape: f32[16,16], index: 0, kind: input, shape index: {}]   ;;  %s554_s1 = inlined_call_operand.hbm [shape: f32[2,1,8], index: 1, kind: output, shape index: {}]  }
   0x1   :  { %8 = vsyncpa [#allocation3 + $0x1], 0 }
   0x2   :  { %9 = vsyncpa [#allocation4], 0 }
   0x3   :  { %11 = vsyncpa [#allocation4 + $0x1], 0  ;;  %s391_s6 = smov 0   ;;  %s393_s7 = smov 0  }
   0x4   :  { %s395_s8 = smov 0   ;;  %s397_s9 = smov 0  }
   0x5 LB: > { %s412_s10 = sadd.s32 4294967295, %s377_s9   ;;  %s225_s11 = sadd.s32 4294967294, %s377_s9   ;;  %s377_s9 = sphi %s397_s9, %s569_s9   ;;  %s373_s8 = sphi %s395_s8, %s568_s8   ;;  %s369_s7 = sphi %s393_s7, %s567_s7   ;;  %s365_s6 = sphi %s391_s6, %s566_s6  }
   0x6   : > { %s416_s12 = sadd.s32 1, %s377_s9   ;;  %s24_s13 = sadd.s32 1, %s373_s8 }
   0x7   : > { %s21_s14 = ssub.s32 %s377_s9, %s416_s12  ;;  %p31_p0 = scmp.ne.s32.totalorder %s373_s8, %s369_s7 }
   0x8   : > { %p22_p1 = scmp.eq.s32.totalorder %s21_s14, 0  ;;  %p32_p2 = scmp.eq.s32.totalorder %s377_s9, 0 }
   0x9   : > { %p37_p3 = scmp.ne.s32.totalorder %s369_s7, %s365_s6  ;;  %p38_p4 = scmp.eq.s32.totalorder %s412_s10, 0 }
   0xa   : > { %s428_s15 = scalar_select %p22_p1, %s373_s8, %s24_s13  }
   0xb   : > { %p430_p5 = por %p32_p2, %p31_p0  ;;  %p434_p6 = por %p38_p4, %p37_p3 }
   0xc   : > { %p61_p7 = scmp.eq.s32.totalorder %s412_s10, 1  ;;  %p67_p8 = scmp.eq.s32.totalorder %s225_s11, 1 }
   0xd   : > { %p247_p10 = scmp.lt.s32.totalorder %s377_s9, 2  ;;  %s87_s20 = sand.u32 1, %s373_s8  }
   0xe   : > { %p441_p11 = por %p61_p7, %p31_p0  ;;  %p445_p12 = por %p67_p8, %p37_p3 }
   0xf   : > { %s229_s21 = sshll.u32 %s377_s9, 7  ;;  %s228_s22 = sshll.u32 %s87_s20, 3 }
  0x10   : > { %s558_s18 = scalar_select %p441_p11, 1, 0 }
  0x11   : > { %s559_s19 = scalar_select %p445_p12, 1, 0 }
  0x12   : > { %s454_s25 = scalar_lea.hbm %s553_s0, %s229_s21  ;;  %s91_s26 = scalar_lea.vmem [#allocation2], %s228_s22 }
  0x13   : > { %s98_s27 = sshll.u32 %s91_s26, 4  ;;  %p458_p13 = pnand %p247_p10, %p430_p5  ;;  %s462_s27 = int_to_ptr.vmem [resolvable:$true] %s98_s27 }
  0x14   : > { %s88_s29 = scalar_lea.sflag [#allocation3], %s87_s20  ;;  %s281_s30 = scalar_lea.hbm %s454_s25, 128 }
  0x15   : > { %p282_p2 = scmp.ne.s32.totalorder %s454_s25, %s281_s30  ;;  %p283_p3 = pneg %p458_p13 }
  0x16   : > { %s286_s4 = scalar_lea.hbm %s553_s0, 256  ;;  %p287_p5 = scmp.lt.u32.totalorder %s454_s25, %s553_s0 }
  0x17   : > { %p284_p4 = pnand %p283_p3, %p282_p2  ;;  %p288_p8 = scmp.lt.u32.totalorder %s286_s4, %s281_s30 }
  0x18   : > { %p290_p9 = scmp.lt.u32.totalorder %s281_s30, %s454_s25 }
  0x19   : > { %p285_p7 = pneg %p284_p4  ;;  %p289_p10 = por %p288_p8, %p287_p5 }
  0x1b   : > { %p291_p0 = por %p290_p9, %p289_p10 }
  0x1d   : > { %p292_p1 = pnand %p291_p0, %p285_p7 }
  0x1f   : > { %295 = shalt.err (!%p292_p1)
}
  0x20   : > { %s296_s13 = scalar_lea.vmem %s462_s27, 128  ;;  %s379_s14 = smov [#allocation2]  }
  0x21   : > { %p297_p2 = scmp.ne.s32.totalorder %s462_s27, %s296_s13  ;;  %s301_s16 = sshll.u32 %s379_s14, 4  ;;  %s302_s16 = int_to_ptr.vmem [resolvable:$false] %s301_s16 }
  0x22   : > { %s303_s20 = scalar_lea.vmem %s302_s16, 256  ;;  %p304_p11 = scmp.lt.s32.totalorder %s462_s27, %s302_s16 }
  0x23   : > { %p299_p4 = pnand %p297_p2, %p283_p3  ;;  %p305_p5 = scmp.lt.s32.totalorder %s303_s20, %s296_s13 }
  0x25   : > { %p300_p12 = pneg %p299_p4  ;;  %p306_p8 = por %p305_p5, %p304_p11 }
  0x27   : > { %p307_p9 = pnand %p306_p8, %p300_p12 }
  0x29   : > { %310 = shalt.err (!%p307_p9)
}
  0x2a   : > { %242 = dma.hbm_to_vmem [thread:$0]  (!%p458_p13), %s454_s25, 128, %s462_s27, %s88_s29  }
  0x2b   : > { %p561_p0 = scmp.lt.s32.totalorder %s377_s9, 3  ;;  %p562_p1 = scmp.ge.s32.totalorder %s377_s9, 1 }
  0x2d   : > { %p104_p3 = pnand %p562_p1, %p561_p0 }
  0x2e   : > { %s496_s21 = sand.u32 (!%p104_p3), 1, %s369_s7  }
  0x2f   : > { %107 = sbr.rel (%p104_p3) target bundleno = 215 (0xd7), region = 24  ;;  %s231_s22 = sshll.u32 (!%p104_p3), %s496_s21, 3 }
  0x30   : > { %s110_s23 = scalar_lea.sflag (!%p104_p3), [#allocation3], %s496_s21  ;;  %s113_s24 = scalar_lea.vmem (!%p104_p3), [#allocation2], %s231_s22 }
  0x36   : > { %356 = dma.done.wait (%p434_p6), %s110_s23, 128  }
  0x37   : > { %358 = vsyncadd (%p434_p6), %s110_s23, 4294967168  ;;  %vm132_vm0 = vcmask 130048   ;;  %v131_v0 = vld [vmem:[%s113_s24] sm:$0xff]  ;;  %v137_v2 = vlaneseq  ;;  %s232_s25 = sshll.u32 %s412_s10, 4  ;;  %s130_s26 = scalar_lea.vmem [#allocation5], %s496_s21  ;;  %vm144_vm1 = vcmask 57344  }
  0x38   : > { %v133_v1 = vsel %vm132_vm0, %v131_v0, -inf  ;;  %s159_s27 = sshll.u32 %s130_s26, 4  ;;  %s509_s29 = scalar_lea.hbm %s554_s1, %s232_s25  ;;  %s511_s27 = int_to_ptr.vmem [resolvable:$true] %s159_s27 }
  0x39   : > { %134 = vmax.xlane.f32.xlu0 %v133_v1  ;;  %v138_v3 = vand.u32 127, %v137_v2  ;;  %v140_v4 = vshrl.u32 %v137_v2, 7  ;;  %s147_s30 = scalar_lea.sflag [#allocation4], %s496_s21  ;;  %s311_s2 = scalar_lea.vmem %s511_s27, 16 }
  0x3a   : > { %p312_p6 = scmp.ne.s32.totalorder %s511_s27, %s311_s2  ;;  %p563_p11 = scmp.ne.s32.totalorder %s558_s18, 0 }
  0x3b   : > { %v141_v5 = vsub.s32 %v138_v3, %v140_v4  ;;  %s380_s10 = smov [#allocation5]  }
  0x3c   : > { %p313_p12 = pnand %p312_p6, %p563_p11  ;;  %s315_s3 = sshll.u32 %s380_s10, 4  ;;  %s316_s3 = int_to_ptr.vmem [resolvable:$false] %s315_s3 }
  0x3d   : > { %s317_s4 = scalar_lea.vmem %s316_s3, 32  ;;  %p318_p7 = scmp.lt.s32.totalorder %s511_s27, %s316_s3 }
  0x3e   : > { %p314_p13 = pneg %p313_p12  ;;  %p319_p10 = scmp.lt.s32.totalorder %s317_s4, %s311_s2 }
  0x40   : > { %p320_p2 = por %p319_p10, %p318_p7 }
  0x42   : > { %p321_p4 = pnand %p320_p2, %p314_p13 }
  0xc6   : > { %v135_v6 = vpop.xlane.xlu0 %134 }
  0xc7   : > { %v142_v7 = vrot.slane %v135_v6, %v141_v5 }
  0xc9   : > { %145 = vst.msk [vmem:[%s130_s26] sm:$0x1] %vm144_vm1, %v142_v7 }
  0xca   : > { %324 = shalt.err (!%p321_p4)
}
  0xcb   : > { %s325_s5 = scalar_lea.hbm %s509_s29, 16  ;;  %s329_s14 = scalar_lea.hbm %s554_s1, 32 }
  0xcc   : > { %p326_p5 = scmp.ne.s32.totalorder %s509_s29, %s325_s5  ;;  %p330_p0 = scmp.lt.u32.totalorder %s509_s29, %s554_s1 }
  0xcd   : > { %p331_p1 = scmp.lt.u32.totalorder %s329_s14, %s325_s5  ;;  %p333_p6 = scmp.lt.u32.totalorder %s325_s5, %s509_s29 }
  0xce   : > { %p327_p8 = pnand %p326_p5, %p563_p11 }
  0xcf   : > { %p332_p3 = por %p331_p1, %p330_p0 }
  0xd0   : > { %p328_p9 = pneg %p327_p8 }
  0xd1   : > { %p334_p12 = por %p333_p6, %p332_p3 }
  0xd3   : > { %p335_p13 = pnand %p334_p12, %p328_p9 }
  0xd5   : > { %338 = shalt.err (!%p335_p13)
}
  0xd6   : > { %237 = dma.vmem_to_hbm [thread:$0]  (%p563_p11), %s511_s27, 16, %s509_s29, %s147_s30  }
  0xd7 PF: > { %s171_s21 = sand.u32 1, %s365_s6   ;;  %p564_p7 = scmp.ne.s32.totalorder %s559_s19, 0 }
  0xd8   : > { %p565_p10 = scmp.ge.s32.totalorder %s377_s9, 2  ;;  %s172_s22 = scalar_lea.sflag [#allocation4], %s171_s21 }
  0xda   : > { %p244_p2 = pnand %p565_p10, %p564_p7 }
  0xdc   : > { %360 = dma.done.wait (!%p244_p2), %s172_s22, 16  }
  0xdd   : > { %362 = vsyncadd (!%p244_p2), %s172_s22, 4294967280  ;;  %p14_p4 = scmp.ge.s32.totalorder %s416_s12, 4   ;;  %s566_s6 = smov %s369_s7 }
  0xde   : > { %s567_s7 = smov %s373_s8  ;;  %s568_s8 = smov %s428_s15 }
  0xdf   : > { %s569_s9 = smov %s416_s12  ;;  %16 = sbr.rel (!%p14_p4) target bundleno = 5 (0x5), region = 69 }
  0xe6   :  { %176 = vsyncpa [#allocation3], 1 }
  0xe7   :  { %178 = vsyncpa [#allocation3 + $0x1], 1 }
  0xe8   :  { %179 = vsyncpa [#allocation4], 1 }
  0xe9   :  { %181 = vsyncpa [#allocation4 + $0x1], 1 }

</bundles_post_ra>
